<compile_context>
chip_gen: v7x
topology: tpu7x:2x2x1
jax: 0.10.0
libtpu: 0.0.40
codegen_flags: <defaults>
</compile_context>

<pallas_src>
import functools
import math

import jax
import jax.numpy as jnp
from jax.experimental import pallas as pl
from jax.experimental.pallas import tpu as pltpu


# --------------------------------------------------------------------------- hardware
def _physical_vmem_bytes():
    """Physical VMEM per core; conservative v7x fallback (64 MiB) if unknown."""
    try:
        return int(pltpu.get_tpu_info().vmem_capacity_bytes)
    except Exception:
        return 64 * 1024 * 1024


def _is_v5e():
    try:
        kind = jax.devices()[0].device_kind.lower()
        return ("v5 lite" in kind) or ("v5e" in kind) or ("v5litepod" in kind)
    except Exception:
        return False


def _sublane_multiple(dtype):
    # f32 packs 8 rows per sublane group, bf16 packs 16, int8 packs 32.
    return {4: 8, 2: 16, 1: 32}.get(jnp.dtype(dtype).itemsize, 8)


# ----------------------------------------------------------------------------- kernel
def _attend(q, k, v, mask, inv_scale, out_dtype, attn_dtype, bf16_softmax):
    # QK^T with contraction on the last dims of both operands -> no XLU transpose of K.
    s = jnp.einsum("bqd,bkd->bqk", q, k, preferred_element_type=jnp.float32)
    if inv_scale != 1.0:
        s = s * jnp.float32(inv_scale)
    if mask is not None:
        s = jnp.where(mask != 0, jnp.float32(-1e9), s)      # masked_fill(mask, -1e9)
    # Numerically stable softmax over the key axis (dim=2). Exact reciprocal so the
    # returned attention rows sum to 1 (PyTorch parity).
    s = s - jnp.max(s, axis=-1, keepdims=True)
    if bf16_softmax:
        # bf16 EUP exp on v6e/v7x: ~2x exp throughput, half the vreg pressure for p.
        e = jnp.exp(s.astype(jnp.bfloat16))
        denom = jnp.sum(e.astype(jnp.float32), axis=-1, keepdims=True)
        p = e * pl.reciprocal(denom, approx=False).astype(jnp.bfloat16)
    else:
        e = jnp.exp(s)
        p = e * pl.reciprocal(jnp.sum(e, axis=-1, keepdims=True), approx=False)
    out = jnp.einsum("bqk,bkd->bqd", p.astype(v.dtype), v,
                     preferred_element_type=jnp.float32)
    return out.astype(out_dtype), p.astype(attn_dtype)


def _sdpa_kernel(q_ref, k_ref, v_ref, out_ref, attn_ref, *, inv_scale, bf16_softmax):
    out, p = _attend(q_ref[...], k_ref[...], v_ref[...], None, inv_scale,
                     out_ref.dtype, attn_ref.dtype, bf16_softmax)
    out_ref[...] = out
    attn_ref[...] = p


def _sdpa_masked_kernel(q_ref, k_ref, v_ref, m_ref, out_ref, attn_ref, *,
                        inv_scale, bf16_softmax):
    out, p = _attend(q_ref[...], k_ref[...], v_ref[...], m_ref[...], inv_scale,
                     out_ref.dtype, attn_ref.dtype, bf16_softmax)
    out_ref[...] = out
    attn_ref[...] = p


# ----------------------------------------------------------------------- tile pickers
def _choose_q_tile(Lq, sub, target):
    """Pick (TQ, padded_Lq). Prefer the largest `sub`-aligned divisor of Lq <= target;
    for awkward lengths fall back to an aligned tile of ~target and a padded Lq."""
    if Lq <= target:
        return Lq, Lq                                  # full-extent block: always legal
    for t in range(min(target, Lq), sub - 1, -1):
        if t % sub == 0 and Lq % t == 0:
            return t, Lq
    t = max(sub, (target // sub) * sub)
    lq_pad = ((Lq + t - 1) // t) * t
    return t, lq_pad


def _pick_batch_tile(B, per_b_bytes, budget_bytes):
    for t in range(B, 0, -1):
        if B % t == 0 and t * per_b_bytes <= budget_bytes:
            return t
    return 1   # even a single batch element overshoots; vmem_limit headroom absorbs it


# ----------------------------------------------------------------------------- wrapper
def scaled_dot_product_attention(q, k, v, mask=None, *, scale=True, attn_dtype=None):
    """Pallas TPU implementation of _ScaledDotProductAttention.forward.

    q: (B, Lq, D), k: (B, Lk, D), v: (B, Lk, Dv)
    mask: optional boolean (True = masked out), shape (B, Lq, Lk), (1, Lq, Lk) or (Lq, Lk).
    Returns (output (B, Lq, Dv), attn (B, Lq, Lk)).
    """
    q = jnp.asarray(q)
    k = jnp.asarray(k)
    v = jnp.asarray(v)
    B, Lq, D = q.shape
    Bk, Lk, Dk = k.shape
    Bv, Lv, Dv = v.shape
    assert B == Bk == Bv and D == Dk and Lk == Lv, "inconsistent q/k/v shapes"

    out_dtype = q.dtype
    attn_dtype = out_dtype if attn_dtype is None else jnp.dtype(attn_dtype)
    inv_scale = (1.0 / math.sqrt(D)) if scale else 1.0
    # exp/normalize in bf16 only where the EUP/VPU support it (v6e/v7x) and inputs are bf16.
    bf16_softmax = (out_dtype == jnp.bfloat16) and not _is_v5e()

    # ------------------------------------------------------------------------- mask
    has_mask = mask is not None
    mask_is_broadcast = False
    if has_mask:
        mask = jnp.asarray(mask)
        if mask.ndim == 2:
            mask = mask[None]
        assert mask.shape[1:] == (Lq, Lk) and mask.shape[0] in (1, B), "bad mask shape"
        mask = (mask != 0).astype(jnp.int8)            # int8: 4x less HBM traffic than i32
        mask_is_broadcast = (mask.shape[0] == 1)

    # --------------------------------------------------- generation-aware tile sizing
    phys_vmem = _physical_vmem_bytes()                 # 128 MiB v5e/v6e, 64 MiB v7x
    budget_bytes = int(0.45 * phys_vmem)               # block-sizing working-set budget
    vmem_limit_bytes = int(0.75 * phys_vmem)           # headroom for compiler scratch

    itemsize = jnp.dtype(q.dtype).itemsize
    out_isz = jnp.dtype(out_dtype).itemsize
    attn_isz = jnp.dtype(attn_dtype).itemsize

    sub = max(_sublane_multiple(q.dtype), _sublane_multiple(attn_dtype))
    if has_mask:
        sub = max(sub, 32)                             # int8 mask packs 32 rows/sublane grp

    def per_batch_bytes(tq, kv_bufs):
        b = 2 * tq * D * itemsize                      # q tile (double-buffered)
        b += kv_bufs * Lk * (D + Dv) * itemsize        # K and V blocks
        b += 2 * tq * Dv * out_isz                     # output tile
        b += 2 * tq * Lk * attn_isz                    # attn tile
        b += 3 * tq * Lk * 4                           # f32 s/e/p softmax temporaries
        if has_mask:
            b += 2 * tq * Lk                           # int8 mask tile
        return b

    # Grow TQ first (lane-dense attn streaming, fewer grid steps), then TB.
    TQ, Lq_pad = _choose_q_tile(Lq, sub, target=512)
    while per_batch_bytes(TQ, 2) > budget_bytes and TQ > sub:
        TQ, Lq_pad = _choose_q_tile(Lq, sub, target=max(sub, TQ // 2))

    num_q_steps = Lq_pad // TQ
    # K/V are constant across the qi axis: single-buffer them when large and reused,
    # reclaiming VMEM for bigger TQ/TB (one exposed DMA per batch tile).
    single_kv = (num_q_steps > 1) and (Lk * (D + Dv) * itemsize >= (1 << 20))
    kv_bufs = 1 if single_kv else 2

    TB = _pick_batch_tile(B, per_batch_bytes(TQ, kv_bufs), budget_bytes)

    # ---------------------------------------------------------------------- padding
    Lq_out = Lq
    if Lq_pad != Lq:
        q = jnp.pad(q, ((0, 0), (0, Lq_pad - Lq), (0, 0)))
        if has_mask:
            mask = jnp.pad(mask, ((0, 0), (0, Lq_pad - Lq), (0, 0)))
        Lq = Lq_pad

    grid = (B // TB, Lq // TQ)

    # ------------------------------------------------------------------------ specs
    q_spec = pl.BlockSpec((TB, TQ, D), lambda b, qi: (b, qi, 0))
    kv_map = lambda b, qi: (b, 0, 0)                   # resident across the qi axis
    if single_kv:
        k_spec = pl.BlockSpec((TB, Lk, D), kv_map, pipeline_mode=pl.Buffered(1))
        v_spec = pl.BlockSpec((TB, Lk, Dv), kv_map, pipeline_mode=pl.Buffered(1))
    else:
        k_spec = pl.BlockSpec((TB, Lk, D), kv_map)
        v_spec = pl.BlockSpec((TB, Lk, Dv), kv_map)

    out_specs = (
        pl.BlockSpec((TB, TQ, Dv), lambda b, qi: (b, qi, 0)),
        pl.BlockSpec((TB, TQ, Lk), lambda b, qi: (b, qi, 0)),
    )
    out_shape = (
        jax.ShapeDtypeStruct((B, Lq, Dv), out_dtype),
        jax.ShapeDtypeStruct((B, Lq, Lk), attn_dtype),
    )

    cost = pl.CostEstimate(
        flops=2 * B * Lq * Lk * D + 2 * B * Lq * Lk * Dv,
        transcendentals=B * Lq * Lk,
        bytes_accessed=((B * Lq * D + B * Lk * D + B * Lk * Dv) * itemsize
                        + B * Lq * Dv * out_isz + B * Lq * Lk * attn_isz
                        + (int(mask.size) if has_mask else 0)),
    )

    compiler_params = pltpu.CompilerParams(
        # Shard grid across TensorCores along batch only: sharding along qi would make
        # both v7x cores DMA the same K/V block (doubling K/V HBM reads).
        dimension_semantics=("parallel", "arbitrary"),
        vmem_limit_bytes=vmem_limit_bytes,
    )

    if not has_mask:
        fn = pl.pallas_call(
            functools.partial(_sdpa_kernel, inv_scale=inv_scale,
                              bf16_softmax=bf16_softmax),
            out_shape=out_shape,
            grid_spec=pltpu.PrefetchScalarGridSpec(
                num_scalar_prefetch=0, grid=grid,
                in_specs=[q_spec, k_spec, v_spec],
                out_specs=out_specs),
            compiler_params=compiler_params,
            cost_estimate=cost,
        )
        out, attn = fn(q, k, v)
    else:
        if mask_is_broadcast:
            # Broadcast mask: one (1, TQ, Lk) block reused for every batch tile.
            m_spec = pl.BlockSpec((1, TQ, Lk), lambda b, qi: (0, qi, 0))
        else:
            m_spec = pl.BlockSpec((TB, TQ, Lk), lambda b, qi: (b, qi, 0))
        fn = pl.pallas_call(
            functools.partial(_sdpa_masked_kernel, inv_scale=inv_scale,
                              bf16_softmax=bf16_softmax),
            out_shape=out_shape,
            grid_spec=pltpu.PrefetchScalarGridSpec(
                num_scalar_prefetch=0, grid=grid,
                in_specs=[q_spec, k_spec, v_spec, m_spec],
                out_specs=out_specs),
            compiler_params=compiler_params,
            cost_estimate=cost,
        )
        out, attn = fn(q, k, v, mask)

    if Lq_out != Lq:
        out = out[:, :Lq_out]
        attn = attn[:, :Lq_out]
    return out, attn


# --------------------------------------------------------------------------- reference
def _reference(q, k, v, mask=None, scale=True):
    q = q.astype(jnp.float32)
    k = k.astype(jnp.float32)
    v = v.astype(jnp.float32)
    attn = jnp.einsum("bqd,bkd->bqk", q, k, precision=jax.lax.Precision.HIGHEST)
    if scale:
        attn = attn / jnp.sqrt(jnp.float32(k.shape[-1]))
    if mask is not None:
        attn = jnp.where(mask, -1e9, attn)
    attn = jax.nn.softmax(attn, axis=2)
    out = jnp.einsum("bqk,bkd->bqd", attn, v, precision=jax.lax.Precision.HIGHEST)
    return out, attn


if __name__ == "__main__":
    key = jax.random.PRNGKey(0)
    kq, kk, kv = jax.random.split(key, 3)

    B, Lq, Lk, D, Dv = 2, 8, 8, 32, 32
    q = jax.random.normal(kq, (B, Lq, D), dtype=jnp.float32)
    k = jax.random.normal(kk, (B, Lk, D), dtype=jnp.float32)
    v = jax.random.normal(kv, (B, Lk, Dv), dtype=jnp.float32)
    # boolean mask (True = masked out), shape (B, Lq, Lk)
    mask = jnp.broadcast_to(
        jnp.triu(jnp.ones((Lq, Lk), dtype=bool), k=1)[None], (B, Lq, Lk))

    tol = dict(atol=2e-3, rtol=2e-3)

    # --- no-mask path ---
    out, attn = jax.block_until_ready(scaled_dot_product_attention(q, k, v))
    ref_out, ref_attn = _reference(q, k, v, None, True)
    assert jnp.allclose(out, ref_out, **tol)
    assert jnp.allclose(attn, ref_attn, **tol)

    # --- per-batch mask path ---
    out_m, attn_m = jax.block_until_ready(
        scaled_dot_product_attention(q, k, v, mask=mask))
    ref_out_m, ref_attn_m = _reference(q, k, v, mask, True)
    assert jnp.allclose(out_m, ref_out_m, **tol)
    assert jnp.allclose(attn_m, ref_attn_m, **tol)

    # --- shared (broadcast-over-batch) mask path ---
    out_s, attn_s = jax.block_until_ready(
        scaled_dot_product_attention(q, k, v, mask=mask[:1]))
    assert jnp.allclose(out_s, ref_out_m, **tol)
    assert jnp.allclose(attn_s, ref_attn_m, **tol)

    print("KERNEL_OK")
</pallas_src>

<mosaic_0001>
module attributes {stable_mosaic.version = 11 : i64} {
  func.func @_sdpa_kernel(%arg0: i32, %arg1: i32, %arg2: memref<2x8x32xf32, #tpu.memory_space<vmem>>, %arg3: memref<2x8x32xf32, #tpu.memory_space<vmem>>, %arg4: memref<2x8x32xf32, #tpu.memory_space<vmem>>, %arg5: memref<2x8x32xf32, #tpu.memory_space<vmem>>, %arg6: memref<2x8x8xf32, #tpu.memory_space<vmem>>) attributes {dimension_semantics = [#tpu.dimension_semantics<parallel>, #tpu.dimension_semantics<arbitrary>], iteration_bounds = array<i64: 1, 1>, scalar_prefetch = 0 : i64, scratch_operands = 0 : i64, tpu.core_type = #tpu.core_type<tc>, window_params = [{transform_indices = @transform_0, window_bounds = array<i64: 2, 8, 32>}, {transform_indices = @transform_1, window_bounds = array<i64: 2, 8, 32>}, {transform_indices = @transform_2, window_bounds = array<i64: 2, 8, 32>}, {transform_indices = @transform_3, window_bounds = array<i64: 2, 8, 32>}, {transform_indices = @transform_4, window_bounds = array<i64: 2, 8, 8>}]} {
    %c0 = arith.constant 0 : index
    %c0_0 = arith.constant 0 : index
    %c0_1 = arith.constant 0 : index
    %0 = vector.load %arg2[%c0, %c0_0, %c0_1] : memref<2x8x32xf32, #tpu.memory_space<vmem>>, vector<2x8x32xf32>
    %c0_2 = arith.constant 0 : index
    %c0_3 = arith.constant 0 : index
    %c0_4 = arith.constant 0 : index
    %1 = vector.load %arg3[%c0_2, %c0_3, %c0_4] : memref<2x8x32xf32, #tpu.memory_space<vmem>>, vector<2x8x32xf32>
    %c0_5 = arith.constant 0 : index
    %c0_6 = arith.constant 0 : index
    %c0_7 = arith.constant 0 : index
    %2 = vector.load %arg4[%c0_5, %c0_6, %c0_7] : memref<2x8x32xf32, #tpu.memory_space<vmem>>, vector<2x8x32xf32>
    "tpu.trace_start"() <{level = 10 : i32, message = "bqd,bkd->bqk"}> : () -> ()
    %cst = arith.constant dense<0.000000e+00> : vector<2x8x8xf32>
    %3 = tpu.matmul %0, %1, %cst {dimension_numbers = #tpu.dot_dimension_numbers<[2], [2], [1], [1], [0, 0, 0, 1, 1, 1], [0], [0]>} : vector<2x8x32xf32>, vector<2x8x32xf32>, vector<2x8x8xf32> -> vector<2x8x8xf32>
    "tpu.trace_stop"() : () -> ()
    %cst_8 = arith.constant 0.176776692 : f32
    %4 = vector.broadcast %cst_8 : f32 to vector<2x8x8xf32>
    %5 = arith.mulf %3, %4 : vector<2x8x8xf32>
    %cst_9 = arith.constant dense<0xFF800000> : vector<2x8xf32>
    %6 = vector.multi_reduction <maximumf>, %5, %cst_9 [2] : vector<2x8x8xf32> to vector<2x8xf32>
    %7 = vector.shape_cast %6 : vector<2x8xf32> to vector<2x8x1xf32>
    %8 = vector.broadcast %7 : vector<2x8x1xf32> to vector<2x8x8xf32>
    %9 = arith.subf %5, %8 : vector<2x8x8xf32>
    %10 = math.exp %9 : vector<2x8x8xf32>
    %cst_10 = arith.constant dense<0.000000e+00> : vector<2x8xf32>
    %11 = vector.multi_reduction <add>, %10, %cst_10 [2] : vector<2x8x8xf32> to vector<2x8xf32>
    %12 = vector.shape_cast %11 : vector<2x8xf32> to vector<2x8x1xf32>
    %13 = tpu.reciprocal %12 : vector<2x8x1xf32> -> vector<2x8x1xf32>
    %14 = vector.broadcast %13 : vector<2x8x1xf32> to vector<2x8x8xf32>
    %15 = arith.mulf %10, %14 : vector<2x8x8xf32>
    "tpu.trace_start"() <{level = 10 : i32, message = "bqk,bkd->bqd"}> : () -> ()
    %cst_11 = arith.constant dense<0.000000e+00> : vector<2x8x32xf32>
    %16 = tpu.matmul %15, %2, %cst_11 {dimension_numbers = #tpu.dot_dimension_numbers<[2], [1], [1], [2], [0, 0, 0, 1, 1, 2], [0], [0]>} : vector<2x8x8xf32>, vector<2x8x32xf32>, vector<2x8x32xf32> -> vector<2x8x32xf32>
    "tpu.trace_stop"() : () -> ()
    %c0_12 = arith.constant 0 : index
    %c0_13 = arith.constant 0 : index
    %c0_14 = arith.constant 0 : index
    %17 = vector.load %arg5[%c0_12, %c0_13, %c0_14] : memref<2x8x32xf32, #tpu.memory_space<vmem>>, vector<2x8x32xf32>
    tpu.vector_store %arg5[%c0_12, %c0_13, %c0_14], %16 {strides = array<i32>} : memref<2x8x32xf32, #tpu.memory_space<vmem>>, vector<2x8x32xf32>,
    %c0_15 = arith.constant 0 : index
    %c0_16 = arith.constant 0 : index
    %c0_17 = arith.constant 0 : index
    %18 = vector.load %arg6[%c0_15, %c0_16, %c0_17] : memref<2x8x8xf32, #tpu.memory_space<vmem>>, vector<2x8x8xf32>
    tpu.vector_store %arg6[%c0_15, %c0_16, %c0_17], %15 {strides = array<i32>} : memref<2x8x8xf32, #tpu.memory_space<vmem>>, vector<2x8x8xf32>,
    return
  }
  func.func @transform_0(%arg0: i32, %arg1: i32) -> (i32, i32, i32) {
    %c0_i32 = arith.constant 0 : i32
    %c0_i32_0 = arith.constant 0 : i32
    return %arg0, %arg1, %c0_i32 : i32, i32, i32
  }
  func.func @transform_1(%arg0: i32, %arg1: i32) -> (i32, i32, i32) {
    %c0_i32 = arith.constant 0 : i32
    %c0_i32_0 = arith.constant 0 : i32
    %c0_i32_1 = arith.constant 0 : i32
    return %arg0, %c0_i32, %c0_i32_0 : i32, i32, i32
  }
  func.func @transform_2(%arg0: i32, %arg1: i32) -> (i32, i32, i32) {
    %c0_i32 = arith.constant 0 : i32
    %c0_i32_0 = arith.constant 0 : i32
    %c0_i32_1 = arith.constant 0 : i32
    return %arg0, %c0_i32, %c0_i32_0 : i32, i32, i32
  }
  func.func @transform_3(%arg0: i32, %arg1: i32) -> (i32, i32, i32) {
    %c0_i32 = arith.constant 0 : i32
    %c0_i32_0 = arith.constant 0 : i32
    return %arg0, %arg1, %c0_i32 : i32, i32, i32
  }
  func.func @transform_4(%arg0: i32, %arg1: i32) -> (i32, i32, i32) {
    %c0_i32 = arith.constant 0 : i32
    %c0_i32_0 = arith.constant 0 : i32
    return %arg0, %arg1, %c0_i32 : i32, i32, i32
  }
}

</mosaic_0001>

<bundles_post_ra>
// kernel: tpu_custom_call.1
= control target key start
LH: loop header
LB: loop body
LE: loop exit
PB: predicated region body
PF: predicated region fallthrough
CT: control target
= control target key end

     0   :  { %10 = vsyncpa [#allocation3], 0  ;;  %s730_s0 = inlined_call_operand.hbm [shape: f32[2,8,32], index: 0, kind: input, shape index: {}]   ;;  %s731_s1 = inlined_call_operand.hbm [shape: f32[2,8,32], index: 1, kind: input, shape index: {}]   ;;  %s732_s2 = inlined_call_operand.hbm [shape: f32[2,8,32], index: 2, kind: input, shape index: {}]   ;;  %s733_s3 = inlined_call_operand.hbm [shape: f32[2,8,32], index: 3, kind: output, shape index: {0}]   ;;  %s734_s4 = inlined_call_operand.hbm [shape: f32[2,8,8], index: 4, kind: output, shape index: {1}]  }
   0x1   :  { %11 = vsyncpa [#allocation6], 0 }
   0x2   :  { %12 = vsyncpa [#allocation4], 0 }
   0x3   :  { %13 = vsyncpa [#allocation10], 0  ;;  %s596_s15 = smov [#allocation5]   ;;  %s597_s17 = smov [#allocation2]  }
   0x4   :  { %s31_s16 = sshll.u32 %s596_s15, 4  ;;  %s19_s18 = sshll.u32 %s597_s17, 4  ;;  %s32_s16 = int_to_ptr.vmem [resolvable:$true] %s31_s16  ;;  %s630_s18 = int_to_ptr.vmem [resolvable:$true] %s19_s18 }
   0x5   :  { %s478_s21 = scalar_lea.hbm %s731_s1, 256 }
   0x6   :  { %p479_p0 = scmp.ne.s32.totalorder %s731_s1, %s478_s21  ;;  %p482_p1 = scmp.lt.u32.totalorder %s478_s21, %s731_s1 }
   0x8   :  { %p484_p2 = pnand %p482_p1, %p479_p0 }
   0xa   :  { %487 = shalt.err (!%p484_p2)
}
   0xb   :  { %s488_s26 = scalar_lea.vmem %s32_s16, 256  ;;  %p493_p4 = scmp.lt.s32.totalorder %s32_s16, %s32_s16 }
   0xc   :  { %p489_p3 = scmp.ne.s32.totalorder %s32_s16, %s488_s26  ;;  %p494_p5 = scmp.lt.s32.totalorder %s488_s26, %s488_s26 }
   0xe   :  { %p495_p6 = por %p494_p5, %p493_p4 }
  0x10   :  { %p496_p7 = pnand %p495_p6, %p489_p3 }
  0x12   :  { %499 = shalt.err (!%p496_p7)
}
  0x13   :  { %s598_s27 = smov 128   ;;  %s599_s28 = smov 8  }
  0x14   :  { %37 = dma.hbm_to_vmem [thread:$0]  %s731_s1, 256, %s32_s16, [#allocation6], %s598_s27, %s598_s27, %s599_s28  }
  0x15   :  { %s500_s7 = scalar_lea.hbm %s730_s0, 256 }
  0x16   :  { %p501_p8 = scmp.ne.s32.totalorder %s730_s0, %s500_s7  ;;  %p504_p9 = scmp.lt.u32.totalorder %s500_s7, %s730_s0 }
  0x18   :  { %p506_p10 = pnand %p504_p9, %p501_p8 }
  0x1a   :  { %509 = shalt.err (!%p506_p10)
}
  0x1b   :  { %s510_s12 = scalar_lea.vmem %s630_s18, 256  ;;  %p515_p12 = scmp.lt.s32.totalorder %s630_s18, %s630_s18 }
  0x1c   :  { %p511_p11 = scmp.ne.s32.totalorder %s630_s18, %s510_s12  ;;  %p516_p13 = scmp.lt.s32.totalorder %s510_s12, %s510_s12 }
  0x1e   :  { %p517_p0 = por %p516_p13, %p515_p12 }
  0x20   :  { %p518_p1 = pnand %p517_p0, %p511_p11 }
  0x22   :  { %521 = shalt.err (!%p518_p1)
}
  0x23   :  { %25 = dma.hbm_to_vmem [thread:$0]  %s730_s0, 256, %s630_s18, [#allocation3], %s598_s27, %s598_s27, %s599_s28  }
  0x24   :  { %s600_s14 = smov [#allocation7]   ;;  %s522_s19 = scalar_lea.hbm %s732_s2, 256 }
  0x25   :  { %s43_s15 = sshll.u32 %s600_s14, 4  ;;  %p523_p2 = scmp.ne.s32.totalorder %s732_s2, %s522_s19  ;;  %s44_s15 = int_to_ptr.vmem [resolvable:$true] %s43_s15 }
  0x26   :  { %p526_p3 = scmp.lt.u32.totalorder %s522_s19, %s732_s2 }
  0x28   :  { %p528_p4 = pnand %p526_p3, %p523_p2 }
  0x2a   :  { %531 = shalt.err (!%p528_p4)
}
  0x2b   :  { %s532_s24 = scalar_lea.vmem %s44_s15, 256  ;;  %p537_p6 = scmp.lt.s32.totalorder %s44_s15, %s44_s15 }
  0x2c   :  { %p533_p5 = scmp.ne.s32.totalorder %s44_s15, %s532_s24  ;;  %p538_p7 = scmp.lt.s32.totalorder %s532_s24, %s532_s24 }
  0x2e   :  { %p539_p8 = por %p538_p7, %p537_p6 }
  0x30   :  { %p540_p9 = pnand %p539_p8, %p533_p5 }
  0x32   :  { %543 = shalt.err (!%p540_p9)
}
  0x33   :  { %49 = dma.hbm_to_vmem [thread:$0]  %s732_s2, 256, %s44_s15, [#allocation6], %s598_s27, %s598_s27, %s599_s28  }
  0x34   :  { %588 = dma.done.wait [#allocation3], 256  }
  0x35   :  { %589 = vsyncadd [#allocation3], 4294967040 }
  0x36   :  { %590 = dma.done.wait [#allocation6], 512  }
  0x37   :  { %591 = vsyncadd [#allocation6], 4294966784  ;;  %v601_v0 = vmov 0.0   ;;  %vm602_vm0 = vmmov 0   ;;  %vm65_vm1 = vcmask 261120   ;;  %v61_v1 = vld [vmem:[#allocation5] sm:$0xff] }
  0x38   :  { %441 = vmatprep.subr.mxu0 %v601_v0  ;;  %443 = vmatprep.mubr.msk.f32.mxu0 %vm602_vm0, %v601_v0  ;;  %v62_v2 = vld [vmem:[#allocation5 + $0x8] sm:$0xff]  ;;  %v59_v3 = vld [vmem:[#allocation2] sm:$0xff]  ;;  %v60_v4 = vld [vmem:[#allocation2 + $0x8] sm:$0xff]  ;;  %vm220_vm2 = vcmask 64512   ;;  %s603_s2 = smov [#allocation9]  }
  0x39   :  { %446 = vmatprep.subr.mxu1 %v601_v0  ;;  %448 = vmatprep.mubr.msk.f32.mxu1 %vm602_vm0, %v601_v0  ;;  %v63_v23 = vld [vmem:[#allocation7] sm:$0xff]  ;;  %v64_v24 = vld [vmem:[#allocation7 + $0x8] sm:$0xff]  ;;  %s410_s25 = sshll.u32 %s603_s2, 4  ;;  %s411_s25 = int_to_ptr.vmem [resolvable:$true] %s410_s25 }
  0x3a   :  { %442 = vmatpush3.xpose.msk.msra.mxu0 %vm65_vm1, %v61_v1  ;;  %447 = vmatpush3.xpose.msk.msra.mxu1 %vm65_vm1, %v62_v2  ;;  %s544_s26 = scalar_lea.vmem %s411_s25, 256  ;;  %p549_p11 = scmp.lt.s32.totalorder %s411_s25, %s411_s25 }
  0x3b   :  { %451 = vmatprep.subr.mxu0 %v601_v0  ;;  %456 = vmatprep.subr.mxu1 %v601_v0  ;;  %p545_p10 = scmp.ne.s32.totalorder %s411_s25, %s544_s26  ;;  %p550_p12 = scmp.lt.s32.totalorder %s544_s26, %s544_s26 }
  0x3d   :  { %444 = vmatmul.mubr.msk.f32.vlgmr.msra.gmra.mrb[0].mxu0 %vm65_vm1, %v59_v3  ;;  %449 = vmatmul.mubr.msk.f32.vlgmr.msra.gmra.mrb[0].mxu1 %vm65_vm1, %v60_v4  ;;  %p551_p13 = por %p550_p12, %p549_p11 }
  0x3e   :  { %453 = vmatprep.mubr.msk.f32.mxu0 %vm602_vm0, %v601_v0  ;;  %458 = vmatprep.mubr.msk.f32.mxu1 %vm602_vm0, %v601_v0 }
  0x3f   :  { %452 = vmatpush3.msra.mxu0 %v63_v23  ;;  %457 = vmatpush3.msra.mxu1 %v64_v24  ;;  %p552_p0 = pnand %p551_p13, %p545_p10 }
 0x110   :  { %v138_v5 = vpop.f32.mrb[0].mxu0  ;;  %v214_v6 = vpop.f32.mrb[0].mxu1 }
 0x111   :  { %v218_v7 = vmul.f32 0.17677669, %v138_v5  ;;  %v445_v8 = vpop.f32.mrb[1].mxu0  ;;  %v219_v9 = vmul.f32 0.17677669, %v214_v6  ;;  %v450_v10 = vpop.f32.mrb[1].mxu1 }
 0x113   :  { %v221_v11 = vsel %vm220_vm2, %v218_v7, -inf  ;;  %v224_v12 = vsel %vm220_vm2, %v219_v9, -inf }
 0x114   :  { %222 = vmax.xlane.f32.xlu0 %v221_v11 }
 0x118   :  { %225 = vmax.xlane.f32.xlu0 %v224_v12 }
 0x1a1   :  { %v223_v13 = vpop.xlane.xlu0 %222 }
 0x1a2   :  { %v227_v14 = vsub.f32 %v218_v7, %v223_v13 }
 0x1a4   :  { %v229_v15 = vmul.f32 1.442695, %v227_v14 }
 0x1a5   :  { %v226_v16 = vpop.xlane.xlu0 %225 }
 0x1a6   :  { %470 = vpow2.f32 %v229_v15  ;;  %v228_v17 = vsub.f32 %v219_v9, %v226_v16 }
 0x1a8   :  { %v231_v18 = vmul.f32 1.442695, %v228_v17 }
 0x1aa   :  { %472 = vpow2.f32 %v231_v18 }
 0x1b0   :  { %v471_v19 = vpop.eup %470 }
 0x1b1   :  { %v233_v20 = vsel %vm220_vm2, %v471_v19, 0.0 }
 0x1b2   :  { %234 = vadd.xlane.f32.xlu1 %v233_v20 }
 0x1b4   :  { %v473_v21 = vpop.eup %472 }
 0x1b5   :  { %v236_v22 = vsel %vm220_vm2, %v473_v21, 0.0 }
 0x1b6   :  { %237 = vadd.xlane.f32.xlu1 %v236_v22 }
 0x23f   :  { %v235_v25 = vpop.xlane.xlu1 %234 }
 0x240   :  { %474 = vrcp.f32 %v235_v25 }
 0x243   :  { %v238_v26 = vpop.xlane.xlu1 %237 }
 0x244   :  { %476 = vrcp.f32 %v238_v26 }
 0x24a   :  { %v475_v27 = vpop.eup %474 }
 0x24b   :  { %v241_v28 = vmul.f32 %v475_v27, %v471_v19 }
 0x24d   :  { %391 = vst.msk [vmem:[#allocation9] sm:$0xff] %vm220_vm2, %v241_v28  ;;  %454 = vmatmul.mubr.msk.f32.vlgmr.msra.gmra.mrb[2].mxu0 %vm220_vm2, %v241_v28 }
 0x24e   :  { %v477_v29 = vpop.eup %476 }
 0x24f   :  { %v242_v30 = vmul.f32 %v477_v29, %v473_v21 }
 0x251   :  { %392 = vst.msk [vmem:[#allocation9 + $0x8] sm:$0xff] %vm220_vm2, %v242_v30  ;;  %459 = vmatmul.mubr.msk.f32.vlgmr.msra.gmra.mrb[2].mxu1 %vm220_vm2, %v242_v30 }
 0x252   :  { %555 = shalt.err (!%p552_p0)
}
 0x253   :  { %s556_s5 = scalar_lea.hbm %s734_s4, 256 }
 0x254   :  { %p557_p1 = scmp.ne.s32.totalorder %s734_s4, %s556_s5  ;;  %p560_p2 = scmp.lt.u32.totalorder %s556_s5, %s734_s4 }
 0x256   :  { %p562_p3 = pnand %p560_p2, %p557_p1 }
 0x258   :  { %565 = shalt.err (!%p562_p3)
}
 0x259   :  { %416 = dma.vmem_to_hbm [thread:$0]  %s411_s25, 256, %s734_s4, [#allocation10], %s598_s27, %s598_s27, %s599_s28  }
 0x25a   :  { %s604_s12 = smov [#allocation8]  }
 0x25b   :  { %s398_s1 = sshll.u32 %s604_s12, 4  ;;  %s399_s1 = int_to_ptr.vmem [resolvable:$true] %s398_s1 }
 0x25c   :  { %s566_s13 = scalar_lea.vmem %s399_s1, 256  ;;  %p571_p5 = scmp.lt.s32.totalorder %s399_s1, %s399_s1 }
 0x25d   :  { %p567_p4 = scmp.ne.s32.totalorder %s399_s1, %s566_s13  ;;  %p572_p6 = scmp.lt.s32.totalorder %s566_s13, %s566_s13 }
 0x25f   :  { %p573_p7 = por %p572_p6, %p571_p5 }
 0x261   :  { %p574_p8 = pnand %p573_p7, %p567_p4 }
 0x320   :  { %v312_v31 = vpop.f32.mrb[2].mxu0 }
 0x321   :  { %389 = vst.msk [vmem:[#allocation8] sm:$0xff] %vm65_vm1, %v312_v31  ;;  %v455_v32 = vpop.f32.mrb[3].mxu0 }
 0x324   :  { %v385_v33 = vpop.f32.mrb[2].mxu1 }
 0x325   :  { %390 = vst.msk [vmem:[#allocation8 + $0x8] sm:$0xff] %vm65_vm1, %v385_v33  ;;  %v460_v34 = vpop.f32.mrb[3].mxu1 }
 0x326   :  { %577 = shalt.err (!%p574_p8)
}
 0x327   :  { %s578_s15 = scalar_lea.hbm %s733_s3, 256 }
 0x328   :  { %p579_p9 = scmp.ne.s32.totalorder %s733_s3, %s578_s15  ;;  %p582_p10 = scmp.lt.u32.totalorder %s578_s15, %s733_s3 }
 0x32a   :  { %p584_p11 = pnand %p582_p10, %p579_p9 }
 0x32c   :  { %587 = shalt.err (!%p584_p11)
}
 0x32d   :  { %404 = dma.vmem_to_hbm [thread:$0]  %s399_s1, 256, %s733_s3, [#allocation4], %s598_s27, %s598_s27, %s599_s28  }
 0x32e   :  { %592 = dma.done.wait [#allocation4], 256  }
 0x32f   :  { %593 = vsyncadd [#allocation4], 4294967040 }
 0x330   :  { %594 = dma.done.wait [#allocation10], 256  }
 0x331   :  { %595 = vsyncadd [#allocation10], 4294967040 }
 0x332   :  { %423 = vsyncpa [#allocation3], 1 }
 0x333   :  { %424 = vsyncpa [#allocation6], 1 }
 0x334   :  { %425 = vsyncpa [#allocation4], 1 }
 0x335   :  { %426 = vsyncpa [#allocation10], 1 }

</bundles_post_ra>
